<compile_context>
chip_gen: v6e
topology: v6e:2x2x1
jax: 0.10.0
libtpu: 0.0.40
codegen_flags: <defaults>
</compile_context>

<pallas_src>
import jax
import jax.numpy as jnp
from jax.experimental import pallas as pl
from jax.experimental.pallas import tpu as pltpu

# ----- "settings" from the original module (synthetic, small) --------------
EMBEDDED_FEATURE_SIZE = 32   # EmbeddingSetting.EMBEDDED_FEATURE_SIZE
MAX_SEQUENCE_LENGTH = 32     # EmbeddingSetting.MAX_SEQUENCE_LENGTH
DROPOUT_P = 0.1              # DropoutSetting.POSITION_EMBEDDING (unused in eval)

_SUBLANES = 8    # f32 sublanes per vreg
_LANES = 128     # lanes per vreg


def make_position_encoder(E: int, L: int) -> jnp.ndarray:
    """Reproduces the torch __init__ buffer pe[0, :, 0, :] with shape (E, L)."""
    position = jnp.arange(L, dtype=jnp.float32)                              # (L,)
    normaliser = jnp.exp(
        jnp.arange(0, E, 2, dtype=jnp.float32) * (-4.0 / E))[:, None]        # (E/2, 1)
    angles = position[None, :] * normaliser                                  # (E/2, L)
    pe = jnp.zeros((E, L), dtype=jnp.float32)
    pe = pe.at[0::2, :].set(jnp.sin(angles))
    pe = pe.at[1::2, :].set(jnp.cos(angles))
    return pe


def _slab_rows(N: int) -> int:
    """Per-batch slab rows: 8 (full f32 sublane pack) when lanes stay a multiple of 128."""
    return _SUBLANES if N % (_SUBLANES * _LANES) == 0 else 1


def init_position_embedding(E: int, H: int, T: int, dtype=jnp.float32) -> jnp.ndarray:
    """One-time init (register_buffer analogue): slice the encoder to the current
    sequence length, broadcast over the note axis H, and fold the flat (E*H*T,)
    addend into an (R, N/R) sublane/lane-dense slab.  Runs ONCE, outside the
    per-call path, so no pe materialisation happens per forward call.
    """
    pe_full = make_position_encoder(E, MAX_SEQUENCE_LENGTH)                  # (E, L)
    N = E * H * T
    R = _slab_rows(N)
    pe_flat = jnp.broadcast_to(pe_full[:, None, :T], (E, H, T)).reshape(N)
    return pe_flat.reshape(R, N // R).astype(dtype)


# ----- Pallas kernel: fully-packed elementwise add -------------------------
def pos_embed_kernel(x_ref, pe_ref, o_ref):
    # Blocks are (rows mult. of 8, lanes mult. of 128) or full-array -> unmasked
    # full-vreg vld / vadd / vst.
    o_ref[...] = x_ref[...] + pe_ref[...]
    # TODO(synk): training-mode Dropout would go here (pltpu.prng_seed /
    # pltpu.prng_random_bits mask + 1/(1-p) scale); eval-mode Dropout is identity.


@jax.jit
def position_embedding(x: jnp.ndarray, pe_slab: jnp.ndarray) -> jnp.ndarray:
    """out = Dropout(x + pe[:, :, :, :T]) in eval mode.

    x       : (B, E, H, T) float32 (NCHW-contiguous)
    pe_slab : (R, C) from init_position_embedding, with R*C == E*H*T
    """
    B, E, H, T = x.shape
    N = E * H * T
    R, C = pe_slab.shape
    assert R * C == N, "pe_slab was initialised for a different (E, H, T)"

    # Free reshape of contiguous NCHW data: per-batch slab of R rows x C lanes.
    x_slab = x.reshape(B * R, C)

    if R % _SUBLANES == 0 and C % _LANES == 0:
        # Batch-axis grid, "parallel" semantics (v7x: work shards across both
        # TensorCores at scale; no-op on 1-TC v5e/v6e).  pe's index_map is
        # constant -> fetched once and kept resident in VMEM across steps.
        #
        # Scale-up plan: per-step x/out blocks are R*C*4 bytes each.  If N/B
        # grow, keep blocks >= ~1 MiB (rows mult. of 8, lanes mult. of 128),
        # keep default Buffered(2) pipelining, and budget
        # 2 x (x block + out block) + pe well below the scoped VMEM limit —
        # v7x has only 64 MiB physical VMEM (32 MiB scoped default) vs the
        # 128 MiB of v5e/v6e, so cap tiles accordingly before raising
        # pltpu.CompilerParams(vmem_limit_bytes=...).
        out_slab = pl.pallas_call(
            pos_embed_kernel,
            out_shape=jax.ShapeDtypeStruct((B * R, C), x.dtype),
            grid=(B,),
            in_specs=[
                pl.BlockSpec((R, C), lambda b: (b, 0)),
                pl.BlockSpec((R, C), lambda b: (0, 0)),
            ],
            out_specs=pl.BlockSpec((R, C), lambda b: (b, 0)),
            compiler_params=pltpu.CompilerParams(
                dimension_semantics=("parallel",)),
        )(x_slab, pe_slab)
    else:
        # Fallback for shapes that don't fold into (8k, 128m): single
        # full-array block (block shape == array shape satisfies the tiling
        # rule); correct but sublane-underutilised.
        # TODO(synk): pad N up to a multiple of 1024 instead if this path is hot.
        out_slab = pl.pallas_call(
            pos_embed_kernel,
            out_shape=jax.ShapeDtypeStruct((B * R, C), x.dtype),
            in_specs=[
                pl.BlockSpec((B * R, C), lambda: (0, 0)),
                pl.BlockSpec((R, C), lambda: (0, 0)),
            ],
            out_specs=pl.BlockSpec((B * R, C), lambda: (0, 0)),
        )(x_slab, pe_slab)

    return out_slab.reshape(B, E, H, T)


if __name__ == "__main__":
    B, E, H, T = 2, EMBEDDED_FEATURE_SIZE, 4, 16
    key = jax.random.PRNGKey(0)
    x = jax.random.normal(key, (B, E, H, T), dtype=jnp.float32)

    # "register_buffer" analogue: built once at init, reused every forward call.
    pe_slab = init_position_embedding(E, H, T)

    out = jax.block_until_ready(position_embedding(x, pe_slab))

    # Self-check against the plain-JAX reference (eval-mode dropout = identity).
    pe_full = make_position_encoder(E, MAX_SEQUENCE_LENGTH)
    ref = x + pe_full[None, :, None, :T]
    assert out.shape == x.shape and out.dtype == x.dtype
    assert jnp.allclose(out, ref, atol=1e-6), "mismatch vs reference"

    print("KERNEL_OK")
</pallas_src>

<mosaic_0001>
module attributes {stable_mosaic.version = 11 : i64} {
  func.func @pos_embed_kernel(%arg0: i32, %arg1: memref<8x256xf32, #tpu.memory_space<vmem>>, %arg2: memref<8x256xf32, #tpu.memory_space<vmem>>, %arg3: memref<8x256xf32, #tpu.memory_space<vmem>>) attributes {dimension_semantics = [#tpu.dimension_semantics<parallel>], iteration_bounds = array<i64: 2>, scalar_prefetch = 0 : i64, scratch_operands = 0 : i64, tpu.core_type = #tpu.core_type<tc>, window_params = [{transform_indices = @transform_0, window_bounds = array<i64: 8, 256>}, {pipeline_mode = #tpu.pipeline_mode<synchronous>, transform_indices = @transform_1, window_bounds = array<i64: 8, 256>}, {transform_indices = @transform_2, window_bounds = array<i64: 8, 256>}]} {
    %c0 = arith.constant 0 : index
    %c0_0 = arith.constant 0 : index
    %0 = vector.load %arg1[%c0, %c0_0] : memref<8x256xf32, #tpu.memory_space<vmem>>, vector<8x256xf32>
    %c0_1 = arith.constant 0 : index
    %c0_2 = arith.constant 0 : index
    %1 = vector.load %arg2[%c0_1, %c0_2] : memref<8x256xf32, #tpu.memory_space<vmem>>, vector<8x256xf32>
    %2 = arith.addf %0, %1 : vector<8x256xf32>
    %c0_3 = arith.constant 0 : index
    %c0_4 = arith.constant 0 : index
    %3 = vector.load %arg3[%c0_3, %c0_4] : memref<8x256xf32, #tpu.memory_space<vmem>>, vector<8x256xf32>
    tpu.vector_store %arg3[%c0_3, %c0_4], %2 {strides = array<i32>} : memref<8x256xf32, #tpu.memory_space<vmem>>, vector<8x256xf32>,
    return
  }
  func.func @transform_0(%arg0: i32) -> (i32, i32) {
    %c0_i32 = arith.constant 0 : i32
    %c0_i32_0 = arith.constant 0 : i32
    return %arg0, %c0_i32 : i32, i32
  }
  func.func @transform_1(%arg0: i32) -> (i32, i32) {
    %c0_i32 = arith.constant 0 : i32
    %c0_i32_0 = arith.constant 0 : i32
    %c0_i32_1 = arith.constant 0 : i32
    return %c0_i32, %c0_i32_0 : i32, i32
  }
  func.func @transform_2(%arg0: i32) -> (i32, i32) {
    %c0_i32 = arith.constant 0 : i32
    %c0_i32_0 = arith.constant 0 : i32
    return %arg0, %c0_i32 : i32, i32
  }
}

</mosaic_0001>

<bundles_post_ra>
// kernel: position_embedding.1
= control target key start
LH: loop header
LB: loop body
LE: loop exit
PB: predicated region body
PF: predicated region fallthrough
CT: control target
= control target key end

     0   :  { %s232_s9 = smov 0   ;;  %s263_s0 = inlined_call_operand.vmem [shape: f32[16,256], index: 0, kind: input, shape index: {}]   ;;  %s264_s1 = inlined_call_operand.vmem [shape: f32[8,256], index: 1, kind: input, shape index: {}]   ;;  %s265_s2 = inlined_call_operand.vmem [shape: f32[16,256], index: 2, kind: output, shape index: {}]  }
   0x1 LB: > { %s207_s10 = sadd.s32 4294967295, %s234_s9   ;;  %p211_p0 = scmp.ge.s32.totalorder %s234_s9, 1  ;;  %s234_s9 = sphi %s232_s9, %s12_s9  }
   0x2   : > { %p112_p1 = scmp.lt.s32.totalorder %s234_s9, 3 }
   0x4   : > { %p113_p2 = pnand %p211_p0, %p112_p1 }
   0x5   : > { %p134_p3 = scmp.lt.s32.totalorder (!%p113_p2), %s207_s10, 1 }
   0x6   : > { %116 = sbr.rel (%p113_p2) target bundleno = 18 (0x12), region = 28 }
   0xb   : > { %s267_s10 = smov (!%p134_p3, %s207_s10), 1  ;;  %v146_v0 = vld [vmem:[%s264_s1] sm:$0xff]  ;;  %v147_v1 = vld [vmem:[%s264_s1 + $0x8] sm:$0xff] }
   0xc   : > { %s218_s11 = sshll.u32 %s267_s10, 4 }
   0xd   : > { %s138_s18 = scalar_lea.vmem %s263_s0, %s218_s11  ;;  %s143_s21 = scalar_lea.vmem %s265_s2, %s218_s11 }
   0xe   : > { %v144_v2 = vld [vmem:[%s138_s18] sm:$0xff]  ;;  %v145_v3 = vld [vmem:[%s138_s18 + $0x8] sm:$0xff] }
   0xf   : > { %v148_v4 = vadd.f32 %v146_v0, %v144_v2  ;;  %v149_v5 = vadd.f32 %v147_v1, %v145_v3 }
  0x11   : > { %150 = vst [vmem:[%s143_s21] sm:$0xff] %v148_v4  ;;  %151 = vst [vmem:[%s143_s21 + $0x8] sm:$0xff] %v149_v5 }
  0x12 PF: > { %s12_s9 = sadd.s32 1, %s234_s9  }
  0x13   : > { %p9_p4 = scmp.ge.s32.totalorder %s12_s9, 4  }
  0x15   :  { %11 = sbr.rel (!%p9_p4) target bundleno = 1 (0x1), region = 58 }

</bundles_post_ra>
